<compile_context>
chip_gen: v7x
topology: tpu7x:2x2x1
jax: 0.10.0
libtpu: 0.0.40
codegen_flags: <defaults>
</compile_context>

<pallas_src>
import jax
import jax.numpy as jnp
from jax.experimental import pallas as pl
from jax.experimental.pallas import tpu as pltpu


LANE = 128                                # vreg lane width
_TARGET_BLOCK_BYTES = 4 * 1024 * 1024     # ~4 MiB per grid-step block
_VMEM_LIMIT_BYTES = 32 * 1024 * 1024      # safe on v5e / v6e / v7x


def _relu_kernel(x_ref, o_ref):
    # Elementwise max(x, 0) on the VPU over the whole VMEM tile.
    o_ref[...] = jnp.maximum(x_ref[...], 0)


def _choose_cols(n):
    """Largest lane-dense width (multiple of 128) that exactly divides n."""
    for cols in (4096, 2048, 1024, 512, 256, 128):
        if n % cols == 0:
            return cols
    return None


def relu_pallas(x):
    """ReLU on an arbitrarily-shaped array via the Pallas kernel."""
    orig_shape = x.shape
    dtype = x.dtype
    n = x.size
    if n == 0:
        return x
    itemsize = jnp.dtype(dtype).itemsize

    flat = x.reshape(-1)

    cols = _choose_cols(n)
    padded = False
    if cols is None:
        # Rare ragged case: pad only up to the lane width (<= 127 elements).
        cols = LANE
        padded_n = ((n + cols - 1) // cols) * cols
        flat = jnp.pad(flat, (0, padded_n - n))
        padded = True
    else:
        padded_n = n

    rows = padded_n // cols

    # Block row count targeting ~4 MiB per block, multiple of 8 sublanes.
    block_rows = max(8, (_TARGET_BLOCK_BYTES // (cols * itemsize)) // 8 * 8)
    if block_rows >= rows:
        block_rows = rows  # full-extent block is always legal
    # Keep >= 2 grid steps when possible so v7x can shard the parallel axis
    # across both TensorCores.
    if rows > 8:
        while pl.cdiv(rows, block_rows) < 2 and block_rows > 8:
            block_rows = max(8, (block_rows // 2) // 8 * 8)

    grid = (pl.cdiv(rows, block_rows),)

    x2d = flat.reshape(rows, cols)
    y2d = pl.pallas_call(
        _relu_kernel,
        out_shape=jax.ShapeDtypeStruct((rows, cols), dtype),
        grid=grid,
        in_specs=[pl.BlockSpec((block_rows, cols), lambda i: (i, 0))],
        out_specs=pl.BlockSpec((block_rows, cols), lambda i: (i, 0)),
        compiler_params=pltpu.CompilerParams(
            dimension_semantics=("parallel",),
            vmem_limit_bytes=_VMEM_LIMIT_BYTES,
        ),
        cost_estimate=pl.CostEstimate(
            flops=n, transcendentals=0, bytes_accessed=2 * n * itemsize),
    )(x2d)

    y = y2d.reshape(-1)
    if padded:
        y = y[:n]
    return y.reshape(orig_shape)


def relu_forward(x):
    """Mirrors ReLU.forward: accepts a single array or a tuple/list of arrays.

    For tuple/list input, concatenates along axis 0 (like torch.cat), applies
    ReLU, then splits back to the original leading sizes (like torch.split).
    """
    split = isinstance(x, (tuple, list))
    if split:
        sizes = [k.shape[0] for k in x]
        x_cat = jnp.concatenate(list(x), axis=0)
    else:
        x_cat = x

    y = relu_pallas(x_cat)

    if split:
        outs = []
        off = 0
        for s in sizes:
            outs.append(y[off:off + s])
            off += s
        return tuple(outs)
    return y


if __name__ == "__main__":
    key = jax.random.PRNGKey(0)
    k1, k2, k3 = jax.random.split(key, 3)

    # Single-tensor path: NCHW input, batch=2, channels=4, spatial=16x16.
    x = jax.random.normal(k1, (2, 4, 16, 16), dtype=jnp.float32)
    y = relu_forward(x)
    y = jax.block_until_ready(y)
    assert y.shape == x.shape and y.dtype == x.dtype
    assert jnp.allclose(y, jnp.maximum(x, 0.0))

    # Tuple path: list of tensors concatenated along batch, then split back.
    xa = jax.random.normal(k2, (2, 4, 16, 16), dtype=jnp.float32)
    xb = jax.random.normal(k3, (3, 4, 16, 16), dtype=jnp.float32)
    ya, yb = relu_forward((xa, xb))
    ya = jax.block_until_ready(ya)
    yb = jax.block_until_ready(yb)
    assert ya.shape == xa.shape and yb.shape == xb.shape
    assert jnp.allclose(ya, jnp.maximum(xa, 0.0))
    assert jnp.allclose(yb, jnp.maximum(xb, 0.0))

    print("KERNEL_OK")
</pallas_src>

<mosaic_0001>
module attributes {stable_mosaic.version = 11 : i64} {
  func.func @_relu_kernel(%arg0: i32, %arg1: memref<1x2048xf32, #tpu.memory_space<vmem>>, %arg2: memref<1x2048xf32, #tpu.memory_space<vmem>>) attributes {dimension_semantics = [#tpu.dimension_semantics<parallel>], iteration_bounds = array<i64: 1>, scalar_prefetch = 0 : i64, scratch_operands = 0 : i64, tpu.core_type = #tpu.core_type<tc>, window_params = [{transform_indices = @transform_0, window_bounds = array<i64: 1, 2048>}, {transform_indices = @transform_1, window_bounds = array<i64: 1, 2048>}]} {
    %c0 = arith.constant 0 : index
    %c0_0 = arith.constant 0 : index
    %0 = vector.load %arg1[%c0, %c0_0] : memref<1x2048xf32, #tpu.memory_space<vmem>>, vector<1x2048xf32>
    %cst = arith.constant 0.000000e+00 : f32
    %1 = vector.broadcast %cst : f32 to vector<1x2048xf32>
    %2 = arith.maximumf %0, %1 : vector<1x2048xf32>
    %c0_1 = arith.constant 0 : index
    %c0_2 = arith.constant 0 : index
    %3 = vector.load %arg2[%c0_1, %c0_2] : memref<1x2048xf32, #tpu.memory_space<vmem>>, vector<1x2048xf32>
    tpu.vector_store %arg2[%c0_1, %c0_2], %2 {strides = array<i32>} : memref<1x2048xf32, #tpu.memory_space<vmem>>, vector<1x2048xf32>,
    return
  }
  func.func @transform_0(%arg0: i32) -> (i32, i32) {
    %c0_i32 = arith.constant 0 : i32
    %c0_i32_0 = arith.constant 0 : i32
    return %arg0, %c0_i32 : i32, i32
  }
  func.func @transform_1(%arg0: i32) -> (i32, i32) {
    %c0_i32 = arith.constant 0 : i32
    %c0_i32_0 = arith.constant 0 : i32
    return %arg0, %c0_i32 : i32, i32
  }
}

</mosaic_0001>

<bundles_post_ra>
// kernel: tpu_custom_call.1
= control target key start
LH: loop header
LB: loop body
LE: loop exit
PB: predicated region body
PF: predicated region fallthrough
CT: control target
= control target key end

     0   :  { %6 = vsyncpa [#allocation3], 0  ;;  %s128_s0 = inlined_call_operand.hbm [shape: f32[1,2048], index: 0, kind: input, shape index: {}]   ;;  %s129_s1 = inlined_call_operand.hbm [shape: f32[1,2048], index: 1, kind: output, shape index: {}]  }
   0x1   :  { %7 = vsyncpa [#allocation4], 0  ;;  %s92_s6 = smov [#allocation2]   ;;  %s44_s10 = scalar_lea.hbm %s128_s0, 256 }
   0x2   :  { %s14_s7 = sshll.u32 %s92_s6, 4  ;;  %p45_p0 = scmp.ne.s32.totalorder %s128_s0, %s44_s10  ;;  %s15_s7 = int_to_ptr.vmem [resolvable:$true] %s14_s7 }
   0x3   :  { %p48_p1 = scmp.lt.u32.totalorder %s44_s10, %s128_s0 }
   0x5   :  { %p50_p2 = pnand %p48_p1, %p45_p0 }
   0x7   :  { %53 = shalt.err (!%p50_p2)
}
   0x8   :  { %s54_s15 = scalar_lea.vmem %s15_s7, 256  ;;  %p59_p4 = scmp.lt.s32.totalorder %s15_s7, %s15_s7 }
   0x9   :  { %p55_p3 = scmp.ne.s32.totalorder %s15_s7, %s54_s15  ;;  %p60_p5 = scmp.lt.s32.totalorder %s54_s15, %s54_s15 }
   0xb   :  { %p61_p6 = por %p60_p5, %p59_p4 }
   0xd   :  { %p62_p7 = pnand %p61_p6, %p55_p3 }
   0xf   :  { %65 = shalt.err (!%p62_p7)
}
  0x10   :  { %17 = dma.hbm_to_vmem [thread:$0]  %s128_s0, 256, %s15_s7, [#allocation3]  }
  0x11   :  { %88 = dma.done.wait [#allocation3], 256  }
  0x12   :  { %89 = vsyncadd [#allocation3], 4294967040  ;;  %s93_s18 = smov [#allocation5]   ;;  %v21_v0 = vld [vmem:[#allocation2] sm:$0xff]  ;;  %v22_v1 = vld [vmem:[#allocation2 + $0x8] sm:$0xff] }
  0x13   :  { %s33_s19 = sshll.u32 %s93_s18, 4  ;;  %v23_v2 = vmax.f32 %v21_v0, 0.0  ;;  %v24_v3 = vmax.f32 %v22_v1, 0.0  ;;  %s34_s19 = int_to_ptr.vmem [resolvable:$true] %s33_s19 }
  0x14   :  { %s66_s20 = scalar_lea.vmem %s34_s19, 256  ;;  %p71_p9 = scmp.lt.s32.totalorder %s34_s19, %s34_s19 }
  0x15   :  { %25 = vst [vmem:[#allocation5] sm:$0xff] %v23_v2  ;;  %26 = vst [vmem:[#allocation5 + $0x8] sm:$0xff] %v24_v3  ;;  %p67_p8 = scmp.ne.s32.totalorder %s34_s19, %s66_s20  ;;  %p72_p10 = scmp.lt.s32.totalorder %s66_s20, %s66_s20 }
  0x17   :  { %p73_p11 = por %p72_p10, %p71_p9 }
  0x19   :  { %p74_p12 = pnand %p73_p11, %p67_p8 }
  0x1b   :  { %77 = shalt.err (!%p74_p12)
}
  0x1c   :  { %s78_s22 = scalar_lea.hbm %s129_s1, 256 }
  0x1d   :  { %p79_p13 = scmp.ne.s32.totalorder %s129_s1, %s78_s22  ;;  %p82_p0 = scmp.lt.u32.totalorder %s78_s22, %s129_s1 }
  0x1f   :  { %p84_p1 = pnand %p82_p0, %p79_p13 }
  0x21   :  { %87 = shalt.err (!%p84_p1)
}
  0x22   :  { %36 = dma.vmem_to_hbm [thread:$0]  %s34_s19, 256, %s129_s1, [#allocation4]  }
  0x23   :  { %90 = dma.done.wait [#allocation4], 256  }
  0x24   :  { %91 = vsyncadd [#allocation4], 4294967040 }
  0x25   :  { %40 = vsyncpa [#allocation3], 1 }
  0x26   :  { %41 = vsyncpa [#allocation4], 1 }

</bundles_post_ra>
